<compile_context>
chip_gen: v6e
topology: v6e:2x2x1
jax: 0.10.0
libtpu: 0.0.40
codegen_flags: <defaults>
</compile_context>

<pallas_src>
import jax
import jax.numpy as jnp
from jax import lax
from jax.experimental import pallas as pl
from jax.experimental.pallas import tpu as pltpu


# ----------------------------------------------------------------------------
# Kernel
# ----------------------------------------------------------------------------
def _extract_feature0_kernel(x_ref, o_ref):
    """x_ref: (tb, ts*F) lane-dense tile of the (B, S*F) view.
    o_ref: (tb, ts) tile of the (B, S) output = feature 0 of every timestep."""
    tb, tsf = x_ref.shape
    ts = o_ref.shape[-1]
    f = tsf // ts

    v = x_ref[...]
    if f == 1:
        # Input is already a plain (B, S) array (fallback path / F == 1):
        # straight lane-dense vld/vst copy.
        o_ref[...] = v
        return

    # Zero every lane that is not a feature-0 lane (VPU work, hidden under DMA)
    # so values of discarded features (incl. NaN/Inf) never reach the matmul.
    col = lax.broadcasted_iota(jnp.int32, (tb, tsf), 1)
    keep = (col % f) == 0
    v32 = jnp.where(keep, v, jnp.zeros_like(v)).astype(jnp.float32)

    # 0/1 selection matrix sel[j, s] = (j == s*f): compacts lane s*f -> lane s.
    j_idx = lax.broadcasted_iota(jnp.int32, (tsf, ts), 0)
    s_idx = lax.broadcasted_iota(jnp.int32, (tsf, ts), 1)
    sel = jnp.where(j_idx == s_idx * f, 1.0, 0.0).astype(jnp.float32)

    # Split each f32 into three pieces with <= 8 significand bits each (every
    # piece is exactly representable in bf16), so the MXU reconstructs the
    # value exactly no matter how it decomposes the f32 matmul.
    def _top16(y):  # zero the low 16 bits -> bf16-exact value
        bits = pltpu.bitcast(y, jnp.uint32)
        return pltpu.bitcast(bits & jnp.uint32(0xFFFF0000), jnp.float32)

    p1 = _top16(v32)
    r1 = v32 - p1
    p2 = _top16(r1)
    p3 = r1 - p2

    acc = (jnp.dot(p1, sel, preferred_element_type=jnp.float32)
           + jnp.dot(p2, sel, preferred_element_type=jnp.float32)
           + jnp.dot(p3, sel, preferred_element_type=jnp.float32))
    o_ref[...] = acc.astype(o_ref.dtype)


# ----------------------------------------------------------------------------
# Tiling helpers (generation aware)
# ----------------------------------------------------------------------------
def _round_up(x: int, m: int) -> int:
    return ((x + m - 1) // m) * m


def _as_pos_int(v):
    try:
        v = int(v)
        return v if v > 0 else None
    except Exception:
        return None


def _tpu_topology():
    """(num_tensorcores, vmem_capacity_bytes), with conservative defaults."""
    cores, vmem = 1, 64 * 1024 * 1024  # v7x-safe defaults
    try:
        info = pltpu.get_tpu_info()
        for attr in ("vmem_capacity_bytes", "vmem_bytes", "vmem_size_bytes"):
            v = _as_pos_int(getattr(info, attr, None))
            if v:
                vmem = v
                break
        for attr in ("num_cores", "core_count", "num_tensorcores",
                     "tensorcore_count"):
            c = _as_pos_int(getattr(info, attr, None))
            if c:
                cores = c
                break
    except Exception:
        pass
    return cores, vmem


def _choose_tiles(B, S, F, itemsize, step_budget, num_cores):
    """Pick (tb, ts); None if the fused extraction cannot fit the VMEM budget."""
    sub = max(8, 32 // itemsize)  # sublane granule of the block's 2nd-minor dim

    def fixed(ts):   # selection matrix + iota temporaries (f32 / i32)
        return 3 * ts * ts * F * 4 if F > 1 else 0

    def per_row(ts):  # double-buffered in/out blocks + in-kernel f32 temps
        return 2 * itemsize * ts * F + 16 * ts * F + (2 * itemsize + 4) * ts

    def fits(ts):
        return fixed(ts) + sub * per_row(ts) <= step_budget

    if fits(S):
        ts = S                       # last dims equal to full dims are allowed
    else:
        ts, cand = None, 128         # otherwise use 128-lane-aligned tiles
        while cand <= S:
            if fits(cand):
                ts = cand
            cand *= 2
        if ts is None:
            return None
    ns = pl.cdiv(S, ts)

    avail = step_budget - fixed(ts)
    tb = max(1, avail // per_row(ts))
    if tb >= B:
        tb = B
    else:
        tb = min(B, max(sub, (tb // sub) * sub))

    # Multi-TensorCore chips (v7x): best-effort even number of grid steps so
    # both cores get equal work; single-TC chips keep the serial loop minimal.
    if num_cores >= 2 and B >= 2 * sub and (pl.cdiv(B, tb) * ns) % 2 == 1:
        nb2 = pl.cdiv(B, tb) + 1
        tb = min(tb, max(sub, _round_up(pl.cdiv(B, nb2), sub)))
    return tb, ts


# ----------------------------------------------------------------------------
# pallas_call launcher
# ----------------------------------------------------------------------------
def _feature0_pallas(x2d: jax.Array, F: int) -> jax.Array:
    """x2d: (B, S*F) row-major view of (B, S, F).  Returns (B, S) = x[:, :, 0]."""
    B, SF = x2d.shape
    assert SF % F == 0
    S = SF // F
    itemsize = x2d.dtype.itemsize

    num_cores, vmem_cap = _tpu_topology()
    # v5e/v6e (128 MiB physical): limit 64 MiB, 32 MiB/step.
    # v7x     (64 MiB physical):  limit 32 MiB, 16 MiB/step.
    vmem_limit = int(min(64 << 20, max(32 << 20, vmem_cap // 2)))
    step_budget = vmem_limit // 2

    tiles = _choose_tiles(B, S, F, itemsize, step_budget, num_cores)
    if tiles is None:
        raise ValueError("fused feature-0 extraction does not fit VMEM")
    tb, ts = tiles
    grid = (pl.cdiv(B, tb), pl.cdiv(S, ts))

    cost = pl.CostEstimate(
        flops=0, transcendentals=0,
        bytes_accessed=(B * SF + B * S) * itemsize)  # pure memory traffic

    return pl.pallas_call(
        _extract_feature0_kernel,
        out_shape=jax.ShapeDtypeStruct((B, S), x2d.dtype),
        grid_spec=pltpu.PrefetchScalarGridSpec(
            num_scalar_prefetch=0,
            grid=grid,
            # Lane-dense blocks on both sides; the input block is contiguous
            # in HBM (full-bandwidth DMA), the output block is S-wide.
            in_specs=[pl.BlockSpec((tb, ts * F), lambda i, j: (i, j))],
            out_specs=pl.BlockSpec((tb, ts), lambda i, j: (i, j)),
        ),
        compiler_params=pltpu.CompilerParams(
            dimension_semantics=("parallel", "parallel"),
            vmem_limit_bytes=vmem_limit,
        ),
        cost_estimate=cost,
    )(x2d)


def baseline_forecast(x: jax.Array) -> jax.Array:
    """Equivalent of BaselineForecast.forward for a (B, S, F) input."""
    assert x.ndim == 3, "expected (batch, seq, features)"
    B, S, F = x.shape

    if jnp.issubdtype(x.dtype, jnp.floating):
        try:
            # Single HBM pass: free (B,S,F)->(B,S*F) reshape + fused extraction.
            out2d = _feature0_pallas(x.reshape(B, S * F), F)
            return out2d.reshape(B, S, 1)
        except Exception:
            pass  # fall back to the verified two-pass path below

    # Fallback (non-float dtypes / fused lowering rejected): XLA strided slice
    # (one pass) followed by the same kernel in pure lane-dense copy mode.
    out2d = _feature0_pallas(x[:, :, 0], 1)
    return out2d.reshape(B, S, 1)


# ----------------------------------------------------------------------------
# Demo / self-test
# ----------------------------------------------------------------------------
if __name__ == "__main__":
    key = jax.random.PRNGKey(0)
    k1, k2 = jax.random.split(key)

    # Small case consistent with the forward pass: batch=2, seq=8, features=4.
    x = jax.random.normal(k1, (2, 8, 4), dtype=jnp.float32)
    out = jax.block_until_ready(baseline_forecast(x))
    ref = x[:, :, 0].reshape(x.shape[0], -1, 1)
    assert out.shape == ref.shape == (2, 8, 1)
    assert jnp.allclose(out, ref), "mismatch on (2, 8, 4)"

    # Larger case: exercises (8, 128)-aligned blocks and batch tiling logic.
    x2 = jax.random.normal(k2, (32, 256, 8), dtype=jnp.float32)
    out2 = jax.block_until_ready(baseline_forecast(x2))
    ref2 = x2[:, :, 0].reshape(x2.shape[0], -1, 1)
    assert out2.shape == ref2.shape == (32, 256, 1)
    assert jnp.allclose(out2, ref2), "mismatch on (32, 256, 8)"

    print("KERNEL_OK")
</pallas_src>

<mosaic_0001>
module attributes {stable_mosaic.version = 11 : i64} {
  func.func @_extract_feature0_kernel(%arg0: i32, %arg1: i32, %arg2: memref<2x32xf32, #tpu.memory_space<vmem>>, %arg3: memref<2x8xf32, #tpu.memory_space<vmem>>) attributes {dimension_semantics = [#tpu.dimension_semantics<parallel>, #tpu.dimension_semantics<parallel>], iteration_bounds = array<i64: 1, 1>, scalar_prefetch = 0 : i64, scratch_operands = 0 : i64, tpu.core_type = #tpu.core_type<tc>, window_params = [{transform_indices = @transform_0, window_bounds = array<i64: 2, 32>}, {transform_indices = @transform_1, window_bounds = array<i64: 2, 8>}]} {
    %c0 = arith.constant 0 : index
    %c0_0 = arith.constant 0 : index
    %0 = vector.load %arg2[%c0, %c0_0] : memref<2x32xf32, #tpu.memory_space<vmem>>, vector<2x32xf32>
    %1 = tpu.iota {dimensions = array<i32: 1>} : vector<2x32xi32>
    %c4_i32 = arith.constant 4 : i32
    %c0_i32 = arith.constant 0 : i32
    %2 = arith.cmpi eq, %c4_i32, %c0_i32 : i32
    %c1_i32 = arith.constant 1 : i32
    %3 = arith.select %2, %c1_i32, %c4_i32 : i32
    %4 = vector.broadcast %3 : i32 to vector<2x32xi32>
    %5 = arith.remsi %1, %4 : vector<2x32xi32>
    %c0_i32_1 = arith.constant 0 : i32
    %6 = vector.broadcast %c0_i32_1 : i32 to vector<2x32xi32>
    %7 = arith.cmpi ne, %5, %6 : vector<2x32xi32>
    %c0_i32_2 = arith.constant 0 : i32
    %8 = vector.broadcast %c0_i32_2 : i32 to vector<2x32xi32>
    %9 = arith.cmpi slt, %5, %8 : vector<2x32xi32>
    %c0_i32_3 = arith.constant 0 : i32
    %10 = arith.cmpi slt, %3, %c0_i32_3 : i32
    %11 = vector.broadcast %10 : i1 to vector<2x32xi1>
    %12 = vector.broadcast %11 : vector<2x32xi1> to vector<2x32xi1>
    %13 = arith.xori %9, %12 : vector<2x32xi1>
    %14 = arith.andi %13, %7 : vector<2x32xi1>
    %15 = vector.broadcast %3 : i32 to vector<2x32xi32>
    %16 = arith.addi %5, %15 : vector<2x32xi32>
    %17 = arith.select %14, %16, %5 : vector<2x32xi1>, vector<2x32xi32>
    %c0_i32_4 = arith.constant 0 : i32
    %18 = vector.broadcast %c0_i32_4 : i32 to vector<2x32xi32>
    %19 = arith.cmpi eq, %17, %18 : vector<2x32xi32>
    %cst = arith.constant 0.000000e+00 : f32
    %20 = vector.broadcast %cst : f32 to vector<2x32xf32>
    %21 = arith.select %19, %0, %20 : vector<2x32xi1>, vector<2x32xf32>
    %22 = tpu.iota {dimensions = array<i32: 0>} : vector<32x8xi32>
    %23 = tpu.iota {dimensions = array<i32: 1>} : vector<32x8xi32>
    %c4_i32_5 = arith.constant 4 : i32
    %24 = vector.broadcast %c4_i32_5 : i32 to vector<32x8xi32>
    %25 = arith.muli %23, %24 : vector<32x8xi32>
    %26 = arith.cmpi eq, %22, %25 : vector<32x8xi32>
    %cst_6 = arith.constant 1.000000e+00 : f32
    %cst_7 = arith.constant 0.000000e+00 : f32
    %27 = vector.broadcast %cst_6 : f32 to vector<32x8xf32>
    %28 = vector.broadcast %cst_7 : f32 to vector<32x8xf32>
    %29 = arith.select %26, %27, %28 : vector<32x8xi1>, vector<32x8xf32>
    %30 = tpu.bitcast %21 : vector<2x32xf32> -> vector<2x32xi32>
    %c-65536_i32 = arith.constant -65536 : i32
    %31 = vector.broadcast %c-65536_i32 : i32 to vector<2x32xi32>
    %32 = arith.andi %30, %31 : vector<2x32xi32>
    %33 = tpu.bitcast %32 : vector<2x32xi32> -> vector<2x32xf32>
    %34 = arith.subf %21, %33 : vector<2x32xf32>
    %35 = tpu.bitcast %34 : vector<2x32xf32> -> vector<2x32xi32>
    %c-65536_i32_8 = arith.constant -65536 : i32
    %36 = vector.broadcast %c-65536_i32_8 : i32 to vector<2x32xi32>
    %37 = arith.andi %35, %36 : vector<2x32xi32>
    %38 = tpu.bitcast %37 : vector<2x32xi32> -> vector<2x32xf32>
    %39 = arith.subf %34, %38 : vector<2x32xf32>
    %cst_9 = arith.constant dense<0.000000e+00> : vector<2x8xf32>
    %40 = tpu.matmul %33, %29, %cst_9 {dimension_numbers = #tpu.dot_dimension_numbers<[1], [0], [0], [1], [0, 0, 1, 1], [], []>} : vector<2x32xf32>, vector<32x8xf32>, vector<2x8xf32> -> vector<2x8xf32>
    %cst_10 = arith.constant dense<0.000000e+00> : vector<2x8xf32>
    %41 = tpu.matmul %38, %29, %cst_10 {dimension_numbers = #tpu.dot_dimension_numbers<[1], [0], [0], [1], [0, 0, 1, 1], [], []>} : vector<2x32xf32>, vector<32x8xf32>, vector<2x8xf32> -> vector<2x8xf32>
    %42 = arith.addf %40, %41 : vector<2x8xf32>
    %cst_11 = arith.constant dense<0.000000e+00> : vector<2x8xf32>
    %43 = tpu.matmul %39, %29, %cst_11 {dimension_numbers = #tpu.dot_dimension_numbers<[1], [0], [0], [1], [0, 0, 1, 1], [], []>} : vector<2x32xf32>, vector<32x8xf32>, vector<2x8xf32> -> vector<2x8xf32>
    %44 = arith.addf %42, %43 : vector<2x8xf32>
    %c0_12 = arith.constant 0 : index
    %c0_13 = arith.constant 0 : index
    %45 = vector.load %arg3[%c0_12, %c0_13] : memref<2x8xf32, #tpu.memory_space<vmem>>, vector<2x8xf32>
    tpu.vector_store %arg3[%c0_12, %c0_13], %44 {strides = array<i32>} : memref<2x8xf32, #tpu.memory_space<vmem>>, vector<2x8xf32>,
    return
  }
  func.func @transform_0(%arg0: i32, %arg1: i32) -> (i32, i32) {
    %c0_i32 = arith.constant 0 : i32
    return %arg0, %arg1 : i32, i32
  }
  func.func @transform_1(%arg0: i32, %arg1: i32) -> (i32, i32) {
    %c0_i32 = arith.constant 0 : i32
    return %arg0, %arg1 : i32, i32
  }
}

module attributes {stable_mosaic.version = 11 : i64} {
  func.func @_extract_feature0_kernel(%arg0: i32, %arg1: i32, %arg2: memref<2x8xf32, #tpu.memory_space<vmem>>, %arg3: memref<2x8xf32, #tpu.memory_space<vmem>>) attributes {dimension_semantics = [#tpu.dimension_semantics<parallel>, #tpu.dimension_semantics<parallel>], iteration_bounds = array<i64: 1, 1>, scalar_prefetch = 0 : i64, scratch_operands = 0 : i64, tpu.core_type = #tpu.core_type<tc>, window_params = [{transform_indices = @transform_0, window_bounds = array<i64: 2, 8>}, {transform_indices = @transform_1, window_bounds = array<i64: 2, 8>}]} {
    %c0 = arith.constant 0 : index
    %c0_0 = arith.constant 0 : index
    %0 = vector.load %arg2[%c0, %c0_0] : memref<2x8xf32, #tpu.memory_space<vmem>>, vector<2x8xf32>
    %c0_1 = arith.constant 0 : index
    %c0_2 = arith.constant 0 : index
    %1 = vector.load %arg3[%c0_1, %c0_2] : memref<2x8xf32, #tpu.memory_space<vmem>>, vector<2x8xf32>
    tpu.vector_store %arg3[%c0_1, %c0_2], %0 {strides = array<i32>} : memref<2x8xf32, #tpu.memory_space<vmem>>, vector<2x8xf32>,
    return
  }
  func.func @transform_0(%arg0: i32, %arg1: i32) -> (i32, i32) {
    %c0_i32 = arith.constant 0 : i32
    return %arg0, %arg1 : i32, i32
  }
  func.func @transform_1(%arg0: i32, %arg1: i32) -> (i32, i32) {
    %c0_i32 = arith.constant 0 : i32
    return %arg0, %arg1 : i32, i32
  }
}

</mosaic_0001>

<bundles_post_ra>
// kernel: tpu_custom_call.1
= control target key start
LH: loop header
LB: loop body
LE: loop exit
PB: predicated region body
PF: predicated region fallthrough
CT: control target
= control target key end

     0   :  { %6 = vsyncpa [#allocation3], 0  ;;  %s447_s0 = inlined_call_operand.hbm [shape: f32[2,32], index: 0, kind: input, shape index: {}]   ;;  %s448_s1 = inlined_call_operand.hbm [shape: f32[2,8], index: 1, kind: output, shape index: {}]  }
   0x1   :  { %7 = vsyncpa [#allocation4], 0  ;;  %s408_s6 = smov [#allocation2]  }
   0x2   :  { %s14_s7 = sshll.u32 %s408_s6, 4  ;;  %s15_s7 = int_to_ptr.vmem [resolvable:$true] %s14_s7 }
   0x3   :  { %s372_s8 = scalar_lea.vmem %s15_s7, 32  ;;  %p377_p1 = scmp.lt.s32.totalorder %s15_s7, %s15_s7 }
   0x4   :  { %p373_p0 = scmp.ne.s32.totalorder %s15_s7, %s372_s8  ;;  %p378_p2 = scmp.lt.s32.totalorder %s372_s8, %s372_s8 }
   0x6   :  { %p379_p3 = por %p378_p2, %p377_p1 }
   0x8   :  { %p380_p4 = pnand %p379_p3, %p373_p0 }
   0xa   :  { %383 = shalt.err (!%p380_p4)
}
   0xb   :  { %17 = dma.hbm_to_vmem [thread:$0]  %s447_s0, 32, %s15_s7, [#allocation3]  }
   0xc   :  { %404 = dma.done.wait [#allocation3], 32  }
   0xd   :  { %405 = vsyncadd [#allocation3], 4294967264  ;;  %v22_v0 = vlaneseq  ;;  %v409_v1 = vmov 0.0   ;;  %vm410_vm0 = vmmov 0   ;;  %v411_v9 = vmov 1.0   ;;  %s412_s0 = smov [#allocation5]  }
   0xe   :  { %326 = vmatprep.subr.mxu0 %v409_v1  ;;  %337 = vmatprep.subr.mxu1 %v409_v1  ;;  %v21_v10 = vld [vmem:[#allocation2] sm:$0x3]  ;;  %vm60_vm6 = vcmask 261120   ;;  %s287_s11 = sshll.u32 %s412_s0, 4  ;;  %vm279_vm7 = vcmask 58368   ;;  %s288_s11 = int_to_ptr.vmem [resolvable:$true] %s287_s11 }
   0xf   :  { %v23_v2 = vand.u32 127, %v22_v0  ;;  %v39_v3 = vshrl.u32 %v22_v0, 7  ;;  %334 = vmatprep.mubr.msk.f32.mxu0 %vm410_vm0, %v409_v1  ;;  %345 = vmatprep.mubr.msk.f32.mxu1 %vm410_vm0, %v409_v1  ;;  %s384_s12 = scalar_lea.vmem %s288_s11, 32  ;;  %p389_p6 = scmp.lt.s32.totalorder %s288_s11, %s288_s11 }
  0x10   :  { %p385_p5 = scmp.ne.s32.totalorder %s288_s11, %s384_s12  ;;  %p390_p7 = scmp.lt.s32.totalorder %s384_s12, %s384_s12 }
  0x11   :  { %v42_v4 = vadd.s32 24, %v39_v3  ;;  %v43_v5 = vmul.u32 4, %v23_v2  ;;  %v41_v6 = vadd.s32 16, %v39_v3  ;;  %v40_v7 = vadd.s32 8, %v39_v3 }
  0x12   :  { %v28_v8 = vand.u32 3, %v23_v2  ;;  %p391_p8 = por %p390_p7, %p389_p6 }
  0x13   :  { %vm47_vm1 = vcmp.eq.s32.totalorder %v42_v4, %v43_v5  ;;  %vm46_vm2 = vcmp.eq.s32.totalorder %v41_v6, %v43_v5  ;;  %vm45_vm4 = vcmp.eq.s32.totalorder %v40_v7, %v43_v5  ;;  %vm44_vm5 = vcmp.eq.s32.totalorder %v39_v3, %v43_v5 }
  0x14   :  { %327 = vmatpush3.msk.msra.mxu0 %vm47_vm1, %v411_v9  ;;  %338 = vmatpush3.msk.msra.mxu1 %vm47_vm1, %v411_v9  ;;  %vm36_vm3 = vcmp.eq.s32.totalorder %v28_v8, 0  ;;  %p392_p9 = pnand %p391_p8, %p385_p5 }
  0x15   :  { %328 = vmatprep.subr.mxu0 %v409_v1  ;;  %339 = vmatprep.subr.mxu1 %v409_v1  ;;  %v37_v11 = vsel %vm36_vm3, %v21_v10, 0.0 }
  0x16   :  { %329 = vmatpush3.msk.msra.mxu0 %vm46_vm2, %v411_v9  ;;  %340 = vmatpush3.msk.msra.mxu1 %vm46_vm2, %v411_v9  ;;  %v53_v12 = vand.u32 4294901760, %v37_v11 }
  0x17   :  { %330 = vmatprep.subr.mxu0 %v409_v1  ;;  %341 = vmatprep.subr.mxu1 %v409_v1 }
  0x18   :  { %331 = vmatpush3.msk.msra.mxu0 %vm45_vm4, %v411_v9  ;;  %342 = vmatpush3.msk.msra.mxu1 %vm45_vm4, %v411_v9  ;;  %v55_v13 = vsub.f32 %v37_v11, %v53_v12 }
  0x19   :  { %332 = vmatprep.subr.mxu0 %v409_v1  ;;  %343 = vmatprep.subr.mxu1 %v409_v1 }
  0x1a   :  { %333 = vmatpush3.msk.msra.mxu0 %vm44_vm5, %v411_v9  ;;  %344 = vmatpush3.msk.msra.mxu1 %vm44_vm5, %v411_v9  ;;  %v57_v14 = vand.u32 4294901760, %v55_v13 }
  0x1b   :  { %348 = vmatprep.subr.mxu0 %v409_v1  ;;  %346 = vmatmul.mubr.msk.f32.vlgmr.msra.gmra.mxu1 %vm60_vm6, %v53_v12 }
  0x1c   :  { %335 = vmatmul.mubr.msk.f32.vlgmr.msra.gmra.mxu0 %vm60_vm6, %v57_v14  ;;  %v59_v15 = vsub.f32 %v55_v13, %v57_v14 }
  0x1d   :  { %349 = vmatpush3.msk.msra.mxu0 %vm47_vm1, %v411_v9  ;;  %356 = vmatprep.mubr.msk.f32.mxu0 %vm410_vm0, %v409_v1 }
  0x1e   :  { %350 = vmatprep.subr.mxu0 %v409_v1 }
  0x1f   :  { %351 = vmatpush3.msk.msra.mxu0 %vm46_vm2, %v411_v9 }
  0x20   :  { %352 = vmatprep.subr.mxu0 %v409_v1 }
  0x21   :  { %353 = vmatpush3.msk.msra.mxu0 %vm45_vm4, %v411_v9 }
  0x22   :  { %354 = vmatprep.subr.mxu0 %v409_v1 }
  0x23   :  { %355 = vmatpush3.msk.msra.mxu0 %vm44_vm5, %v411_v9 }
  0x24   :  { %357 = vmatmul.mubr.msk.f32.vlgmr.msra.gmra.mxu0 %vm60_vm6, %v59_v15 }
  0xdb   :  { %v201_v16 = vpop.f32.mrf.mxu1 }
  0xdc   :  { %v129_v17 = vpop.f32.mrf.mxu0 }
  0xdd   :  { %v347_v18 = vpop.f32.mrf.mxu1  ;;  %v202_v20 = vadd.f32 %v201_v16, %v129_v17 }
  0xde   :  { %v336_v19 = vpop.f32.mrf.mxu0 }
  0xe4   :  { %v274_v21 = vpop.f32.mrf.mxu0 }
  0xe5   :  { %v278_v22 = vadd.f32 %v274_v21, %v202_v20 }
  0xe6   :  { %v358_v23 = vpop.f32.mrf.mxu0 }
  0xe7   :  { %280 = vst.msk [vmem:[#allocation5] sm:$0x3] %vm279_vm7, %v278_v22 }
  0xe8   :  { %395 = shalt.err (!%p392_p9)
}
  0xe9   :  { %290 = dma.vmem_to_hbm [thread:$0]  %s288_s11, 32, %s448_s1, [#allocation4]  }
  0xea   :  { %406 = dma.done.wait [#allocation4], 32  }
  0xeb   :  { %407 = vsyncadd [#allocation4], 4294967264 }
  0xec   :  { %294 = vsyncpa [#allocation3], 1 }
  0xed   :  { %295 = vsyncpa [#allocation4], 1 }

// kernel: tpu_custom_call.1
= control target key start
LH: loop header
LB: loop body
LE: loop exit
PB: predicated region body
PF: predicated region fallthrough
CT: control target
= control target key end

     0   :  { %6 = vsyncpa [#allocation3], 0  ;;  %s103_s0 = inlined_call_operand.hbm [shape: f32[2,8], index: 0, kind: input, shape index: {}]   ;;  %s104_s1 = inlined_call_operand.hbm [shape: f32[2,8], index: 1, kind: output, shape index: {}]  }
   0x1   :  { %7 = vsyncpa [#allocation4], 0  ;;  %s85_s6 = smov [#allocation2]  }
   0x2   :  { %s14_s7 = sshll.u32 %s85_s6, 4  ;;  %s15_s7 = int_to_ptr.vmem [resolvable:$true] %s14_s7 }
   0x3   :  { %s49_s8 = scalar_lea.vmem %s15_s7, 32  ;;  %p54_p1 = scmp.lt.s32.totalorder %s15_s7, %s15_s7 }
   0x4   :  { %p50_p0 = scmp.ne.s32.totalorder %s15_s7, %s49_s8  ;;  %p55_p2 = scmp.lt.s32.totalorder %s49_s8, %s49_s8 }
   0x6   :  { %p56_p3 = por %p55_p2, %p54_p1 }
   0x8   :  { %p57_p4 = pnand %p56_p3, %p50_p0 }
   0xa   :  { %60 = shalt.err (!%p57_p4)
}
   0xb   :  { %17 = dma.hbm_to_vmem [thread:$0]  %s103_s0, 32, %s15_s7, [#allocation3]  }
   0xc   :  { %81 = dma.done.wait [#allocation3], 32  }
   0xd   :  { %82 = vsyncadd [#allocation3], 4294967264  ;;  %s86_s11 = smov [#allocation5]   ;;  %vm22_vm0 = vcmask 58368   ;;  %v21_v0 = vld [vmem:[#allocation2] sm:$0x3] }
   0xe   :  { %s30_s12 = sshll.u32 %s86_s11, 4  ;;  %23 = vst.msk [vmem:[#allocation5] sm:$0x3] %vm22_vm0, %v21_v0  ;;  %s31_s12 = int_to_ptr.vmem [resolvable:$true] %s30_s12 }
   0xf   :  { %s61_s13 = scalar_lea.vmem %s31_s12, 32  ;;  %p66_p6 = scmp.lt.s32.totalorder %s31_s12, %s31_s12 }
  0x10   :  { %p62_p5 = scmp.ne.s32.totalorder %s31_s12, %s61_s13  ;;  %p67_p7 = scmp.lt.s32.totalorder %s61_s13, %s61_s13 }
  0x12   :  { %p68_p8 = por %p67_p7, %p66_p6 }
  0x14   :  { %p69_p9 = pnand %p68_p8, %p62_p5 }
  0x16   :  { %72 = shalt.err (!%p69_p9)
}
  0x17   :  { %33 = dma.vmem_to_hbm [thread:$0]  %s31_s12, 32, %s104_s1, [#allocation4]  }
  0x18   :  { %83 = dma.done.wait [#allocation4], 32  }
  0x19   :  { %84 = vsyncadd [#allocation4], 4294967264 }
  0x1a   :  { %37 = vsyncpa [#allocation3], 1 }
  0x1b   :  { %38 = vsyncpa [#allocation4], 1 }

</bundles_post_ra>
